<compile_context>
chip_gen: v7x
topology: tpu7x:2x2x1
jax: 0.10.0
libtpu: 0.0.40
codegen_flags: <defaults>
</compile_context>

<pallas_src>
import numpy as np
import jax
import jax.numpy as jnp
from jax.experimental import pallas as pl
from jax.experimental.pallas import tpu as pltpu


# ----------------------------- Pallas kernel -----------------------------

def _attention_concat_time_kernel(g_dp_ref, g_cp_ref, aux_ref, prm_ref, out_ref):
    """One batch tile; batch (TB) lives in the lane dimension everywhere.

    g_*_ref : (S, DP, TB) f32   gathered per-code hidden rows (embed@W.T + b),
                                feature dim zero-padded to DP (multiple of 8)
    aux_ref : (R, TB)     f32   packed rows:
                                  [t_dp(S) | gc_dp(S) | valid_dp(S) |
                                   t_cp(S) | gc_cp(S) | valid_cp(S) |
                                   stat(NS) | ones(1)]
                                gc = Tv[ids] + t * v_t (folded fc contribution)
    prm_ref : (2*DP+NSa, 2) f32 packed small params:
                                  rows [0:DP)      = wt   (time row of W.T)
                                  rows [DP:2DP)    = ctx
                                  rows [2DP:2DP+NSa, 0] = folded stat weights
                                columns: 0 = dp branch, 1 = cp branch
    out_ref : (1, TB)     f32   lane-dense output
    """
    s_dp = g_dp_ref.shape[0]
    s_cp = g_cp_ref.shape[0]
    dpad = g_dp_ref.shape[1]
    prm = prm_ref[...]
    nsa = prm.shape[0] - 2 * dpad
    aux = aux_ref[...]

    def branch(g, t, gc, valid, wt, ctx):
        # g: (S, DP, TB); t/gc/valid: (S, TB); wt/ctx: (DP, 1)
        hid = jnp.tanh(g + t[:, None, :] * wt[None, :, :])          # (S, DP, TB)
        imp = jnp.sum(hid * ctx[None, :, :], axis=1)                # (S, TB)
        imp = jnp.where(valid > 0.5, imp, jnp.float32(-1e9))
        m = jnp.max(imp, axis=0, keepdims=True)                     # (1, TB)
        p = jnp.exp(imp - m)
        w = p / jnp.sum(p, axis=0, keepdims=True)                   # (S, TB)
        # attended @ folded_fc  ==  sum_s w_s * gc_s
        return jnp.sum(w * gc, axis=0, keepdims=True)               # (1, TB)

    o = 0
    t_dp = aux[o:o + s_dp, :]; o += s_dp
    gc_dp = aux[o:o + s_dp, :]; o += s_dp
    va_dp = aux[o:o + s_dp, :]; o += s_dp
    t_cp = aux[o:o + s_cp, :]; o += s_cp
    gc_cp = aux[o:o + s_cp, :]; o += s_cp
    va_cp = aux[o:o + s_cp, :]; o += s_cp
    statr = aux[o:o + nsa, :]                                        # (NSa, TB)

    wt_dp = prm[0:dpad, 0:1]
    wt_cp = prm[0:dpad, 1:2]
    ctx_dp = prm[dpad:2 * dpad, 0:1]
    ctx_cp = prm[dpad:2 * dpad, 1:2]
    ws = prm[2 * dpad:2 * dpad + nsa, 0:1]                           # (NSa, 1)

    c_dp = branch(g_dp_ref[...], t_dp, gc_dp, va_dp, wt_dp, ctx_dp)
    c_cp = branch(g_cp_ref[...], t_cp, gc_cp, va_cp, wt_cp, ctx_cp)
    stat_part = jnp.sum(statr * ws, axis=0, keepdims=True)           # (1, TB)
    out_ref[...] = stat_part + c_dp + c_cp


# ----------------------------- wrapper -----------------------------

def _round_up(x, m):
    return ((x + m - 1) // m) * m


def attention_concat_time_forward(params, stat, dp, cp, dp_t, cp_t):
    """JAX/Pallas equivalent of Attention_ConcatTime.forward (eval mode)."""
    f32 = jnp.float32
    B, num_static = stat.shape
    S_dp = dp.shape[1]
    S_cp = cp.shape[1]
    E_dp = params["embed_dp"].shape[1]
    E_cp = params["embed_cp"].shape[1]
    D_dp, D_cp = E_dp + 1, E_cp + 1
    DP = _round_up(max(D_dp, D_cp), 8)          # padded hidden dim (sublanes)
    NSa = num_static + 1                        # static features + ones column

    # ---- batch tiling: batch lives in the lane dimension ----
    LANE = 128
    TB_MAX = 4096                               # ~6 MiB double-buffered per step
    B_pad = _round_up(B, LANE)
    n_steps = max(1, -(-B_pad // TB_MAX))
    if B_pad > LANE and n_steps < 2:
        n_steps = 2                             # >=2 grid steps: v7x megacore parity
    TB = _round_up(-(-B_pad // n_steps), LANE)
    B_pad = _round_up(B_pad, TB)
    pad = B_pad - B

    def pad_b(x):
        if pad == 0:
            return x
        return jnp.pad(x, ((0, pad),) + ((0, 0),) * (x.ndim - 1))

    stat_p = pad_b(stat.astype(f32))
    dp_p = pad_b(dp.astype(jnp.int32))
    cp_p = pad_b(cp.astype(jnp.int32))
    dp_t_p = pad_b(dp_t.astype(f32))
    cp_t_p = pad_b(cp_t.astype(f32))

    # ---- fold tail linears: out = stat@w_stat + att_dp.v_dp + att_cp.v_cp + b ----
    w_all = params["fc_all_w"].astype(f32)                 # (1, NS + 2)
    w_stat = w_all[0, :num_static]
    w_dp = w_all[0, num_static]
    w_cp = w_all[0, num_static + 1]
    v_dp = w_dp * params["fc_dp_w"].astype(f32)[0]         # (D_dp,)
    v_cp = w_cp * params["fc_cp_w"].astype(f32)[0]         # (D_cp,)
    bias_folded = (w_dp * params["fc_dp_b"].astype(f32)[0]
                   + w_cp * params["fc_cp_b"].astype(f32)[0]
                   + params["fc_all_b"].astype(f32)[0])
    wstat_aug = jnp.concatenate([w_stat, bias_folded[None]])   # (NSa,)

    # ---- fold embedding + hidden weight/bias into per-code tables ----
    def fold_branch(embed, W, b, ctx, v):
        E = embed.shape[1]
        D = E + 1
        WT = W.astype(f32).T                                    # (D, D) = W.T
        TW = embed.astype(f32) @ WT[:E, :] + b.astype(f32)[None, :]   # (C, D)
        Tv = embed.astype(f32) @ v[:E]                          # (C,)
        TWp = jnp.zeros((embed.shape[0], DP), f32).at[:, :D].set(TW)
        wtp = jnp.zeros((DP,), f32).at[:D].set(WT[E, :])        # time row of W.T
        ctxp = jnp.zeros((DP,), f32).at[:D].set(ctx.astype(f32))
        return TWp, wtp, ctxp, Tv, v[E]

    TW_dp, wt_dp, ctx_dp, Tv_dp, vt_dp = fold_branch(
        params["embed_dp"], params["att_dp_w"], params["att_dp_b"],
        params["att_dp_ctx"], v_dp)
    TW_cp, wt_cp, ctx_cp, Tv_cp, vt_cp = fold_branch(
        params["embed_cp"], params["att_cp_w"], params["att_cp_b"],
        params["att_cp_ctx"], v_cp)

    # ---- per-sample streams, transposed so batch is the last (lane) dim ----
    def branch_streams(ids, t, TW, Tv, vt):
        G = jnp.transpose(jnp.take(TW, ids, axis=0), (1, 2, 0))    # (S, DP, B_pad)
        gc = (jnp.take(Tv, ids, axis=0) + t * vt).T                # (S, B_pad)
        valid = (ids > 0).astype(f32).T                            # (S, B_pad)
        return G, t.T, gc, valid

    G_dp, tT_dp, gc_dp, va_dp = branch_streams(dp_p, dp_t_p, TW_dp, Tv_dp, vt_dp)
    G_cp, tT_cp, gc_cp, va_cp = branch_streams(cp_p, cp_t_p, TW_cp, Tv_cp, vt_cp)

    # one packed (R, B_pad) array for every small per-batch stream
    aux = jnp.concatenate(
        [tT_dp, gc_dp, va_dp, tT_cp, gc_cp, va_cp,
         stat_p.T, jnp.ones((1, B_pad), f32)], axis=0)
    R = 3 * S_dp + 3 * S_cp + NSa

    # one packed small-param array
    prm = jnp.zeros((2 * DP + NSa, 2), f32)
    prm = prm.at[0:DP, 0].set(wt_dp).at[0:DP, 1].set(wt_cp)
    prm = prm.at[DP:2 * DP, 0].set(ctx_dp).at[DP:2 * DP, 1].set(ctx_cp)
    prm = prm.at[2 * DP:2 * DP + NSa, 0].set(wstat_aug)

    grid = (B_pad // TB,)
    out = pl.pallas_call(
        _attention_concat_time_kernel,
        out_shape=jax.ShapeDtypeStruct((1, B_pad), f32),
        grid_spec=pltpu.PrefetchScalarGridSpec(
            num_scalar_prefetch=0,
            grid=grid,
            in_specs=[
                pl.BlockSpec((S_dp, DP, TB), lambda i: (0, 0, i)),
                pl.BlockSpec((S_cp, DP, TB), lambda i: (0, 0, i)),
                pl.BlockSpec((R, TB), lambda i: (0, i)),
                pl.BlockSpec((2 * DP + NSa, 2), lambda i: (0, 0)),
            ],
            out_specs=pl.BlockSpec((1, TB), lambda i: (0, i)),
        ),
        compiler_params=pltpu.CompilerParams(
            dimension_semantics=("parallel",),       # shard batch tiles across TCs
            vmem_limit_bytes=32 * 1024 * 1024,
        ),
    )(G_dp, G_cp, aux, prm)

    return out[0, :B]                                # (B,)


# ----------------------------- reference (plain JAX) -----------------------------

def _reference_forward(params, stat, dp, cp, dp_t, cp_t):
    f32 = jnp.float32

    def attention(x, mask, W, b, ctx):
        hidden = jnp.tanh(x @ W.T + b)
        imp = jnp.sum(hidden * ctx, axis=-1)
        imp = jnp.where(mask == 0.0, -1e9, imp)
        w = jax.nn.softmax(imp, axis=-1)
        return jnp.sum(x * w[..., None], axis=-2), w

    embedded_dp = jnp.take(params["embed_dp"], dp, axis=0)
    embedded_cp = jnp.take(params["embed_cp"], cp, axis=0)
    concat_dp = jnp.concatenate([embedded_dp, dp_t[..., None].astype(f32)], -1)
    concat_cp = jnp.concatenate([embedded_cp, cp_t[..., None].astype(f32)], -1)
    att_dp, _ = attention(concat_dp, (dp > 0).astype(f32),
                          params["att_dp_w"], params["att_dp_b"], params["att_dp_ctx"])
    att_cp, _ = attention(concat_cp, (cp > 0).astype(f32),
                          params["att_cp_w"], params["att_cp_b"], params["att_cp_ctx"])
    score_dp = att_dp @ params["fc_dp_w"].T + params["fc_dp_b"]
    score_cp = att_cp @ params["fc_cp_w"].T + params["fc_cp_b"]
    allv = jnp.concatenate([stat.astype(f32), score_dp, score_cp], axis=1)
    out = allv @ params["fc_all_w"].T + params["fc_all_b"]
    return jnp.squeeze(out)


# ----------------------------- param init -----------------------------

def init_params(key, num_static, num_dp_codes, num_cp_codes):
    embed_dp_dim = int(2 * np.ceil(num_dp_codes ** 0.25))
    embed_cp_dim = int(2 * np.ceil(num_cp_codes ** 0.25))
    d_dp = embed_dp_dim + 1
    d_cp = embed_cp_dim + 1
    ks = jax.random.split(key, 14)
    f32 = jnp.float32

    def nrm(k, shape, scale=0.1):
        return (scale * jax.random.normal(k, shape)).astype(f32)

    params = {
        # embeddings (padding_idx=0 -> row 0 zeroed)
        "embed_dp": nrm(ks[0], (num_dp_codes, embed_dp_dim)).at[0].set(0.0),
        "embed_cp": nrm(ks[1], (num_cp_codes, embed_cp_dim)).at[0].set(0.0),
        # Attention(embed_dp_dim + 1)
        "att_dp_w": nrm(ks[2], (d_dp, d_dp)),
        "att_dp_b": nrm(ks[3], (d_dp,)),
        "att_dp_ctx": jax.random.normal(ks[4], (d_dp,)).astype(f32),
        # Attention(embed_cp_dim + 1)
        "att_cp_w": nrm(ks[5], (d_cp, d_cp)),
        "att_cp_b": nrm(ks[6], (d_cp,)),
        "att_cp_ctx": jax.random.normal(ks[7], (d_cp,)).astype(f32),
        # fc_dp / fc_cp : Linear(D, 1)
        "fc_dp_w": nrm(ks[8], (1, d_dp)),
        "fc_dp_b": nrm(ks[9], (1,)),
        "fc_cp_w": nrm(ks[10], (1, d_cp)),
        "fc_cp_b": nrm(ks[11], (1,)),
        # fc_all : Linear(num_static + 2, 1)
        "fc_all_w": nrm(ks[12], (1, num_static + 2)),
        "fc_all_b": nrm(ks[13], (1,)),
    }
    return params


# ----------------------------- main -----------------------------

if __name__ == "__main__":
    num_static, num_dp_codes, num_cp_codes = 5, 30, 50
    S_dp, S_cp = 8, 8

    key = jax.random.PRNGKey(0)
    kp, kd = jax.random.split(key)
    params = init_params(kp, num_static, num_dp_codes, num_cp_codes)

    # Small test (B=2, single grid step) plus a larger one (B=300) that
    # exercises the multi-step grid, batch padding and fully-padded rows.
    for B in (2, 300):
        k1, k2, k3, k4, k5, kd = jax.random.split(kd, 6)
        stat = jax.random.normal(k1, (B, num_static), jnp.float32)
        dp = jax.random.randint(k2, (B, S_dp), 0, num_dp_codes).astype(jnp.int32)
        cp = jax.random.randint(k3, (B, S_cp), 0, num_cp_codes).astype(jnp.int32)
        # guarantee at least one non-padding code per row
        dp = dp.at[:, 0].set(jnp.maximum(dp[:, 0], 1))
        cp = cp.at[:, 0].set(jnp.maximum(cp[:, 0], 1))
        dp_t = jax.random.normal(k4, (B, S_dp), jnp.float32)
        cp_t = jax.random.normal(k5, (B, S_cp), jnp.float32)

        out = attention_concat_time_forward(params, stat, dp, cp, dp_t, cp_t)
        out = jax.block_until_ready(out)

        ref = _reference_forward(params, stat, dp, cp, dp_t, cp_t)
        ref = jax.block_until_ready(ref)

        np.testing.assert_allclose(np.asarray(out), np.asarray(ref),
                                   rtol=1e-4, atol=1e-4)

    print("KERNEL_OK")
</pallas_src>

<mosaic_0001>
module attributes {stable_mosaic.version = 11 : i64} {
  func.func @_attention_concat_time_kernel(%arg0: i32, %arg1: memref<8x8x128xf32, #tpu.memory_space<vmem>>, %arg2: memref<8x8x128xf32, #tpu.memory_space<vmem>>, %arg3: memref<54x128xf32, #tpu.memory_space<vmem>>, %arg4: memref<22x2xf32, #tpu.memory_space<vmem>>, %arg5: memref<1x128xf32, #tpu.memory_space<vmem>>) attributes {dimension_semantics = [#tpu.dimension_semantics<parallel>], iteration_bounds = array<i64: 1>, scalar_prefetch = 0 : i64, scratch_operands = 0 : i64, tpu.core_type = #tpu.core_type<tc>, window_params = [{transform_indices = @transform_0, window_bounds = array<i64: 8, 8, 128>}, {transform_indices = @transform_1, window_bounds = array<i64: 8, 8, 128>}, {transform_indices = @transform_2, window_bounds = array<i64: 54, 128>}, {pipeline_mode = #tpu.pipeline_mode<synchronous>, transform_indices = @transform_3, window_bounds = array<i64: 22, 2>}, {transform_indices = @transform_4, window_bounds = array<i64: 1, 128>}]} {
    %c0 = arith.constant 0 : index
    %c0_0 = arith.constant 0 : index
    %0 = vector.load %arg4[%c0, %c0_0] : memref<22x2xf32, #tpu.memory_space<vmem>>, vector<22x2xf32>
    %c0_1 = arith.constant 0 : index
    %c0_2 = arith.constant 0 : index
    %1 = vector.load %arg3[%c0_1, %c0_2] : memref<54x128xf32, #tpu.memory_space<vmem>>, vector<54x128xf32>
    %2 = vector.extract_strided_slice %1 {offsets = [0, 0], sizes = [8, 128], strides = [1, 1]} : vector<54x128xf32> to vector<8x128xf32>
    %3 = vector.extract_strided_slice %1 {offsets = [8, 0], sizes = [8, 128], strides = [1, 1]} : vector<54x128xf32> to vector<8x128xf32>
    %4 = vector.extract_strided_slice %1 {offsets = [16, 0], sizes = [8, 128], strides = [1, 1]} : vector<54x128xf32> to vector<8x128xf32>
    %5 = vector.extract_strided_slice %1 {offsets = [24, 0], sizes = [8, 128], strides = [1, 1]} : vector<54x128xf32> to vector<8x128xf32>
    %6 = vector.extract_strided_slice %1 {offsets = [32, 0], sizes = [8, 128], strides = [1, 1]} : vector<54x128xf32> to vector<8x128xf32>
    %7 = vector.extract_strided_slice %1 {offsets = [40, 0], sizes = [8, 128], strides = [1, 1]} : vector<54x128xf32> to vector<8x128xf32>
    %8 = vector.extract_strided_slice %1 {offsets = [48, 0], sizes = [6, 128], strides = [1, 1]} : vector<54x128xf32> to vector<6x128xf32>
    %9 = vector.extract_strided_slice %0 {offsets = [0, 0], sizes = [8, 1], strides = [1, 1]} : vector<22x2xf32> to vector<8x1xf32>
    %10 = vector.extract_strided_slice %0 {offsets = [0, 1], sizes = [8, 1], strides = [1, 1]} : vector<22x2xf32> to vector<8x1xf32>
    %11 = vector.extract_strided_slice %0 {offsets = [8, 0], sizes = [8, 1], strides = [1, 1]} : vector<22x2xf32> to vector<8x1xf32>
    %12 = vector.extract_strided_slice %0 {offsets = [8, 1], sizes = [8, 1], strides = [1, 1]} : vector<22x2xf32> to vector<8x1xf32>
    %13 = vector.extract_strided_slice %0 {offsets = [16, 0], sizes = [6, 1], strides = [1, 1]} : vector<22x2xf32> to vector<6x1xf32>
    %c0_3 = arith.constant 0 : index
    %c0_4 = arith.constant 0 : index
    %c0_5 = arith.constant 0 : index
    %14 = vector.load %arg1[%c0_3, %c0_4, %c0_5] : memref<8x8x128xf32, #tpu.memory_space<vmem>>, vector<8x8x128xf32>
    %15 = vector.shape_cast %2 : vector<8x128xf32> to vector<8x1x128xf32>
    %16 = vector.shape_cast %9 : vector<8x1xf32> to vector<1x8x1xf32>
    %17 = vector.broadcast %15 : vector<8x1x128xf32> to vector<8x8x128xf32>
    %18 = vector.broadcast %16 : vector<1x8x1xf32> to vector<8x8x128xf32>
    %19 = arith.mulf %17, %18 : vector<8x8x128xf32>
    %20 = arith.addf %14, %19 : vector<8x8x128xf32>
    %21 = math.tanh %20 : vector<8x8x128xf32>
    %22 = vector.shape_cast %11 : vector<8x1xf32> to vector<1x8x1xf32>
    %23 = vector.broadcast %22 : vector<1x8x1xf32> to vector<8x8x128xf32>
    %24 = arith.mulf %21, %23 : vector<8x8x128xf32>
    %cst = arith.constant dense<0.000000e+00> : vector<8x128xf32>
    %25 = vector.multi_reduction <add>, %24, %cst [1] : vector<8x8x128xf32> to vector<8x128xf32>
    %cst_6 = arith.constant 5.000000e-01 : f32
    %26 = vector.broadcast %cst_6 : f32 to vector<8x128xf32>
    %27 = arith.cmpf ogt, %4, %26 : vector<8x128xf32>
    %cst_7 = arith.constant -1.000000e+09 : f32
    %28 = vector.broadcast %cst_7 : f32 to vector<8x128xf32>
    %29 = arith.select %27, %25, %28 : vector<8x128xi1>, vector<8x128xf32>
    %cst_8 = arith.constant dense<0xFF800000> : vector<128xf32>
    %30 = vector.multi_reduction <maximumf>, %29, %cst_8 [0] : vector<8x128xf32> to vector<128xf32>
    %31 = vector.shape_cast %30 : vector<128xf32> to vector<1x128xf32>
    %32 = vector.broadcast %31 : vector<1x128xf32> to vector<8x128xf32>
    %33 = arith.subf %29, %32 : vector<8x128xf32>
    %34 = math.exp %33 : vector<8x128xf32>
    %cst_9 = arith.constant dense<0.000000e+00> : vector<128xf32>
    %35 = vector.multi_reduction <add>, %34, %cst_9 [0] : vector<8x128xf32> to vector<128xf32>
    %36 = vector.shape_cast %35 : vector<128xf32> to vector<1x128xf32>
    %37 = vector.broadcast %36 : vector<1x128xf32> to vector<8x128xf32>
    %38 = arith.divf %34, %37 : vector<8x128xf32>
    %39 = arith.mulf %38, %3 : vector<8x128xf32>
    %cst_10 = arith.constant dense<0.000000e+00> : vector<128xf32>
    %40 = vector.multi_reduction <add>, %39, %cst_10 [0] : vector<8x128xf32> to vector<128xf32>
    %41 = vector.shape_cast %40 : vector<128xf32> to vector<1x128xf32>
    %c0_11 = arith.constant 0 : index
    %c0_12 = arith.constant 0 : index
    %c0_13 = arith.constant 0 : index
    %42 = vector.load %arg2[%c0_11, %c0_12, %c0_13] : memref<8x8x128xf32, #tpu.memory_space<vmem>>, vector<8x8x128xf32>
    %43 = vector.shape_cast %5 : vector<8x128xf32> to vector<8x1x128xf32>
    %44 = vector.shape_cast %10 : vector<8x1xf32> to vector<1x8x1xf32>
    %45 = vector.broadcast %43 : vector<8x1x128xf32> to vector<8x8x128xf32>
    %46 = vector.broadcast %44 : vector<1x8x1xf32> to vector<8x8x128xf32>
    %47 = arith.mulf %45, %46 : vector<8x8x128xf32>
    %48 = arith.addf %42, %47 : vector<8x8x128xf32>
    %49 = math.tanh %48 : vector<8x8x128xf32>
    %50 = vector.shape_cast %12 : vector<8x1xf32> to vector<1x8x1xf32>
    %51 = vector.broadcast %50 : vector<1x8x1xf32> to vector<8x8x128xf32>
    %52 = arith.mulf %49, %51 : vector<8x8x128xf32>
    %cst_14 = arith.constant dense<0.000000e+00> : vector<8x128xf32>
    %53 = vector.multi_reduction <add>, %52, %cst_14 [1] : vector<8x8x128xf32> to vector<8x128xf32>
    %cst_15 = arith.constant 5.000000e-01 : f32
    %54 = vector.broadcast %cst_15 : f32 to vector<8x128xf32>
    %55 = arith.cmpf ogt, %7, %54 : vector<8x128xf32>
    %cst_16 = arith.constant -1.000000e+09 : f32
    %56 = vector.broadcast %cst_16 : f32 to vector<8x128xf32>
    %57 = arith.select %55, %53, %56 : vector<8x128xi1>, vector<8x128xf32>
    %cst_17 = arith.constant dense<0xFF800000> : vector<128xf32>
    %58 = vector.multi_reduction <maximumf>, %57, %cst_17 [0] : vector<8x128xf32> to vector<128xf32>
    %59 = vector.shape_cast %58 : vector<128xf32> to vector<1x128xf32>
    %60 = vector.broadcast %59 : vector<1x128xf32> to vector<8x128xf32>
    %61 = arith.subf %57, %60 : vector<8x128xf32>
    %62 = math.exp %61 : vector<8x128xf32>
    %cst_18 = arith.constant dense<0.000000e+00> : vector<128xf32>
    %63 = vector.multi_reduction <add>, %62, %cst_18 [0] : vector<8x128xf32> to vector<128xf32>
    %64 = vector.shape_cast %63 : vector<128xf32> to vector<1x128xf32>
    %65 = vector.broadcast %64 : vector<1x128xf32> to vector<8x128xf32>
    %66 = arith.divf %62, %65 : vector<8x128xf32>
    %67 = arith.mulf %66, %6 : vector<8x128xf32>
    %cst_19 = arith.constant dense<0.000000e+00> : vector<128xf32>
    %68 = vector.multi_reduction <add>, %67, %cst_19 [0] : vector<8x128xf32> to vector<128xf32>
    %69 = vector.shape_cast %68 : vector<128xf32> to vector<1x128xf32>
    %70 = vector.broadcast %13 : vector<6x1xf32> to vector<6x128xf32>
    %71 = arith.mulf %8, %70 : vector<6x128xf32>
    %cst_20 = arith.constant dense<0.000000e+00> : vector<128xf32>
    %72 = vector.multi_reduction <add>, %71, %cst_20 [0] : vector<6x128xf32> to vector<128xf32>
    %73 = vector.shape_cast %72 : vector<128xf32> to vector<1x128xf32>
    %74 = arith.addf %73, %41 : vector<1x128xf32>
    %75 = arith.addf %74, %69 : vector<1x128xf32>
    %c0_21 = arith.constant 0 : index
    %c0_22 = arith.constant 0 : index
    %76 = vector.load %arg5[%c0_21, %c0_22] : memref<1x128xf32, #tpu.memory_space<vmem>>, vector<1x128xf32>
    tpu.vector_store %arg5[%c0_21, %c0_22], %75 {strides = array<i32>} : memref<1x128xf32, #tpu.memory_space<vmem>>, vector<1x128xf32>,
    return
  }
  func.func @transform_0(%arg0: i32) -> (i32, i32, i32) {
    %c0_i32 = arith.constant 0 : i32
    %c0_i32_0 = arith.constant 0 : i32
    %c0_i32_1 = arith.constant 0 : i32
    return %c0_i32, %c0_i32_0, %arg0 : i32, i32, i32
  }
  func.func @transform_1(%arg0: i32) -> (i32, i32, i32) {
    %c0_i32 = arith.constant 0 : i32
    %c0_i32_0 = arith.constant 0 : i32
    %c0_i32_1 = arith.constant 0 : i32
    return %c0_i32, %c0_i32_0, %arg0 : i32, i32, i32
  }
  func.func @transform_2(%arg0: i32) -> (i32, i32) {
    %c0_i32 = arith.constant 0 : i32
    %c0_i32_0 = arith.constant 0 : i32
    return %c0_i32, %arg0 : i32, i32
  }
  func.func @transform_3(%arg0: i32) -> (i32, i32) {
    %c0_i32 = arith.constant 0 : i32
    %c0_i32_0 = arith.constant 0 : i32
    %c0_i32_1 = arith.constant 0 : i32
    return %c0_i32, %c0_i32_0 : i32, i32
  }
  func.func @transform_4(%arg0: i32) -> (i32, i32) {
    %c0_i32 = arith.constant 0 : i32
    %c0_i32_0 = arith.constant 0 : i32
    return %c0_i32, %arg0 : i32, i32
  }
}

</mosaic_0001>

<bundles_post_ra>
// kernel: tpu_custom_call.1
= control target key start
LH: loop header
LB: loop body
LE: loop exit
PB: predicated region body
PF: predicated region fallthrough
CT: control target
= control target key end

     0   :  { %9 = vsyncpa [#allocation3], 0  ;;  %s862_s0 = inlined_call_operand.hbm [shape: f32[8,8,128], index: 0, kind: input, shape index: {}]   ;;  %s863_s1 = inlined_call_operand.hbm [shape: f32[8,8,128], index: 1, kind: input, shape index: {}]   ;;  %s864_s2 = inlined_call_operand.hbm [shape: f32[54,128], index: 2, kind: input, shape index: {}]   ;;  %s865_s3 = inlined_call_operand.vmem [shape: f32[22,2], index: 3, kind: input, shape index: {}]   ;;  %s866_s4 = inlined_call_operand.hbm [shape: f32[1,128], index: 4, kind: output, shape index: {}]  }
   0x1   :  { %10 = vsyncpa [#allocation6], 0 }
   0x2   :  { %11 = vsyncpa [#allocation4], 0  ;;  %s718_s15 = smov [#allocation5]   ;;  %s719_s17 = smov [#allocation2]  }
   0x3   :  { %s29_s16 = sshll.u32 %s718_s15, 4  ;;  %s17_s18 = sshll.u32 %s719_s17, 4  ;;  %s30_s16 = int_to_ptr.vmem [resolvable:$true] %s29_s16  ;;  %s752_s18 = int_to_ptr.vmem [resolvable:$true] %s17_s18 }
   0x4   :  { %s624_s21 = scalar_lea.hbm %s863_s1, 1024 }
   0x5   :  { %p625_p0 = scmp.ne.s32.totalorder %s863_s1, %s624_s21  ;;  %p628_p1 = scmp.lt.u32.totalorder %s624_s21, %s863_s1 }
   0x7   :  { %p630_p2 = pnand %p628_p1, %p625_p0 }
   0x9   :  { %633 = shalt.err (!%p630_p2)
}
   0xa   :  { %s634_s26 = scalar_lea.vmem %s30_s16, 1024  ;;  %p639_p4 = scmp.lt.s32.totalorder %s30_s16, %s30_s16 }
   0xb   :  { %p635_p3 = scmp.ne.s32.totalorder %s30_s16, %s634_s26  ;;  %p640_p5 = scmp.lt.s32.totalorder %s634_s26, %s634_s26 }
   0xd   :  { %p641_p6 = por %p640_p5, %p639_p4 }
   0xf   :  { %p642_p7 = pnand %p641_p6, %p635_p3 }
  0x11   :  { %645 = shalt.err (!%p642_p7)
}
  0x12   :  { %s720_s27 = smov 128   ;;  %s721_s28 = smov 8  }
  0x13   :  { %35 = dma.hbm_to_vmem [thread:$0]  %s863_s1, 1024, %s30_s16, [#allocation6], %s720_s27, %s720_s27, %s721_s28  }
  0x14   :  { %s646_s7 = scalar_lea.hbm %s862_s0, 1024 }
  0x15   :  { %p647_p8 = scmp.ne.s32.totalorder %s862_s0, %s646_s7  ;;  %p650_p9 = scmp.lt.u32.totalorder %s646_s7, %s862_s0 }
  0x17   :  { %p652_p10 = pnand %p650_p9, %p647_p8 }
  0x19   :  { %655 = shalt.err (!%p652_p10)
}
  0x1a   :  { %s656_s12 = scalar_lea.vmem %s752_s18, 1024  ;;  %p661_p12 = scmp.lt.s32.totalorder %s752_s18, %s752_s18 }
  0x1b   :  { %p657_p11 = scmp.ne.s32.totalorder %s752_s18, %s656_s12  ;;  %p662_p13 = scmp.lt.s32.totalorder %s656_s12, %s656_s12 }
  0x1d   :  { %p663_p0 = por %p662_p13, %p661_p12 }
  0x1f   :  { %p664_p1 = pnand %p663_p0, %p657_p11 }
  0x21   :  { %667 = shalt.err (!%p664_p1)
}
  0x22   :  { %23 = dma.hbm_to_vmem [thread:$0]  %s862_s0, 1024, %s752_s18, [#allocation3], %s720_s27, %s720_s27, %s721_s28  }
  0x23   :  { %s722_s14 = smov [#allocation7]   ;;  %s668_s19 = scalar_lea.hbm %s864_s2, 896 }
  0x24   :  { %s41_s15 = sshll.u32 %s722_s14, 4  ;;  %p669_p2 = scmp.ne.s32.totalorder %s864_s2, %s668_s19  ;;  %s42_s15 = int_to_ptr.vmem [resolvable:$true] %s41_s15 }
  0x25   :  { %p672_p3 = scmp.lt.u32.totalorder %s668_s19, %s864_s2 }
  0x27   :  { %p674_p4 = pnand %p672_p3, %p669_p2 }
  0x29   :  { %677 = shalt.err (!%p674_p4)
}
  0x2a   :  { %s678_s24 = scalar_lea.vmem %s42_s15, 896  ;;  %p683_p6 = scmp.lt.s32.totalorder %s42_s15, %s42_s15 }
  0x2b   :  { %p679_p5 = scmp.ne.s32.totalorder %s42_s15, %s678_s24  ;;  %p684_p7 = scmp.lt.s32.totalorder %s678_s24, %s678_s24 }
  0x2d   :  { %p685_p8 = por %p684_p7, %p683_p6 }
  0x2f   :  { %p686_p9 = pnand %p685_p8, %p679_p5 }
  0x31   :  { %689 = shalt.err (!%p686_p9)
}
  0x32   :  { %47 = dma.hbm_to_vmem [thread:$0]  %s864_s2, 896, %s42_s15, [#allocation6], %s720_s27, %s720_s27, %s721_s28  }
  0x33   :  { %712 = dma.done.wait [#allocation3], 1024  }
  0x34   :  { %713 = vsyncadd [#allocation3], 4294966272 }
  0x35   :  { %714 = dma.done.wait [#allocation6], 1920  }
  0x36   :  { %715 = vsyncadd [#allocation6], 4294965376  ;;  %v723_v0 = vmov 0   ;;  %v59_v1 = vld [vmem:[%s865_s3] sm:$0xff]  ;;  %v60_v2 = vld [vmem:[%s865_s3 + $0x8] sm:$0xff]  ;;  %v724_v3 = vmov 1   ;;  %v82_v7 = vlaneseq }
  0x37   :  { %576 = vset.pattern.permute.xlu0 %v723_v0  ;;  %578 = vset.pattern.permute.xlu1 %v723_v0  ;;  %v61_v4 = vld [vmem:[%s865_s3 + $0x10] sm:$0x3f]  ;;  %v725_v5 = vmov 1966171168   ;;  %v62_v10 = vld [vmem:[#allocation7] sm:$0xff]  ;;  %v65_v16 = vld [vmem:[#allocation7 + $0x18] sm:$0xff] }
  0x38   :  { %169 = vperm.xlu0 %576, %v59_v1   ;;  %198 = vperm.xlu1 %578, %v60_v2   ;;  %v80_v6 = vunpack.c.l.s4 %v725_v5  ;;  %v83_v9 = vshrl.u32 %v82_v7, 7  ;;  %v78_v12 = vcombine.high %v62_v10, %v62_v10  ;;  %v315_v18 = vcombine.high %v65_v16, %v65_v16  ;;  %v69_v42 = vld [vmem:[#allocation2] sm:$0xff]  ;;  %v70_v43 = vld [vmem:[#allocation2 + $0x8] sm:$0xff]  ;;  %v71_v44 = vld [vmem:[#allocation2 + $0x10] sm:$0xff]  ;;  %s726_s3 = smov [#allocation8]  }
  0x39   :  { %v72_v50 = vld [vmem:[#allocation2 + $0x18] sm:$0xff]  ;;  %v73_v55 = vld [vmem:[#allocation2 + $0x20] sm:$0xff]  ;;  %v74_v60 = vld [vmem:[#allocation2 + $0x28] sm:$0xff]  ;;  %vm266_vm0 = vcmask 1041409   ;;  %vm268_vm1 = vcmask 1042434   ;;  %vm270_vm2 = vcmask 1043459  }
  0x3a   :  { %v81_v8 = vunpack.c.0.s8 %v80_v6  ;;  %v813_v28 = vsub.s32 0, %v83_v9  ;;  %v76_v6 = vld [vmem:[#allocation2 + $0x38] sm:$0xff]  ;;  %vm272_vm3 = vcmask 1044484   ;;  %vm274_vm4 = vcmask 1045509   ;;  %s557_s28 = sshll.u32 %s726_s3, 4  ;;  %s558_s28 = int_to_ptr.vmem [resolvable:$true] %s557_s28 }
  0x3b   :  { %vm276_vm5 = vcmask 1046534   ;;  %vm278_vm6 = vcmask 1047559   ;;  %vm540_vm9 = vcmask 1045504   ;;  %s690_s5 = scalar_lea.vmem %s558_s28, 16  ;;  %s694_s6 = scalar_lea.vmem %s558_s28, 32 }
  0x3c   :  { %577 = vset.pattern.permute.xlu0 %v724_v3  ;;  %579 = vset.pattern.permute.xlu1 %v724_v3  ;;  %v84_v11 = vsub.s32 %v81_v8, %v83_v9  ;;  %p691_p10 = scmp.ne.s32.totalorder %s558_s28, %s690_s5  ;;  %p695_p11 = scmp.lt.s32.totalorder %s558_s28, %s558_s28 }
  0x3d   :  { %405 = vperm.xlu0 %577, %v59_v1   ;;  %433 = vperm.xlu1 %579, %v60_v2   ;;  %v75_v1 = vld [vmem:[#allocation2 + $0x30] sm:$0xff]  ;;  %p696_p12 = scmp.lt.s32.totalorder %s694_s6, %s690_s5 }
  0x3e   :  { %v85_v13 = vrot.slane %v62_v10, %v84_v11  ;;  %v92_v14 = vrot.slane %v78_v12, %v84_v11  ;;  %v322_v19 = vrot.slane %v65_v16, %v84_v11  ;;  %v329_v24 = vrot.slane %v315_v18, %v84_v11 }
  0x3f   :  { %p697_p13 = por %p696_p12, %p695_p11 }
  0x40   :  { %v93_v15 = vcombine.high %v85_v13, %v85_v13  ;;  %v94_v17 = vcombine.high %v92_v14, %v92_v14  ;;  %v101_v20 = vrot.slane %v85_v13, %v84_v11  ;;  %v108_v22 = vrot.slane %v92_v14, %v84_v11 }
  0x41   :  { %580 = vset.pattern.permute.xlu1 %v723_v0  ;;  %581 = vset.pattern.permute.xlu0 %v723_v0  ;;  %v330_v25 = vcombine.high %v322_v19, %v322_v19  ;;  %v331_v31 = vcombine.high %v329_v24, %v329_v24  ;;  %v338_v32 = vrot.slane %v322_v19, %v84_v11  ;;  %v307_v19 = vld [vmem:[#allocation5 + $0x8] sm:$0xff]  ;;  %p698_p0 = pnand %p697_p13, %p691_p10 }
  0x42   :  { %536 = vperm.xlu1 %580, %v61_v4   ;;  %v115_v21 = vrot.slane %v93_v15, %v84_v11  ;;  %v122_v23 = vrot.slane %v94_v17, %v84_v11  ;;  %v123_v26 = vcombine.high %v101_v20, %v101_v20  ;;  %v124_v29 = vcombine.high %v108_v22, %v108_v22  ;;  %v306_v15 = vld [vmem:[#allocation5] sm:$0xff] }
  0x43   :  { %v352_v33 = vrot.slane %v330_v25, %v84_v11  ;;  %v130_v34 = vrot.slane %v101_v20, %v813_v28  ;;  %v146_v38 = vrot.slane %v108_v22, %v813_v28  ;;  %v345_v41 = vrot.slane %v329_v24, %v84_v11  ;;  %v308_v22 = vld [vmem:[#allocation5 + $0x10] sm:$0xff]  ;;  %v309_v25 = vld [vmem:[#allocation5 + $0x18] sm:$0xff] }
  0x44   :  { %v125_v27 = vcombine.high %v115_v21, %v115_v21  ;;  %v126_v30 = vcombine.high %v122_v23, %v122_v23  ;;  %v134_v35 = vrot.slane %v115_v21, %v813_v28  ;;  %v138_v36 = vrot.slane %v123_v26, %v813_v28 }
  0x45   :  { %v150_v39 = vrot.slane %v122_v23, %v813_v28  ;;  %v154_v40 = vrot.slane %v124_v29, %v813_v28  ;;  %v359_v47 = vrot.slane %v331_v31, %v84_v11  ;;  %v360_v48 = vcombine.high %v338_v32, %v338_v32  ;;  %v310_v29 = vld [vmem:[#allocation5 + $0x20] sm:$0xff] }
  0x46   :  { %v142_v37 = vrot.slane %v125_v27, %v813_v28  ;;  %v158_v45 = vrot.slane %v126_v30, %v813_v28  ;;  %v362_v49 = vcombine.high %v352_v33, %v352_v33  ;;  %v367_v58 = vrot.slane %v338_v32, %v813_v28  ;;  %v311_v32 = vld [vmem:[#allocation5 + $0x28] sm:$0xff] }
  0x47   :  { %v371_v59 = vrot.slane %v352_v33, %v813_v28  ;;  %v361_v4 = vcombine.high %v345_v41, %v345_v41  ;;  %v375_v5 = vrot.slane %v360_v48, %v813_v28  ;;  %v363_v8 = vcombine.high %v359_v47, %v359_v47 }
  0x48   :  { %v379_v9 = vrot.slane %v362_v49, %v813_v28  ;;  %v383_v12 = vrot.slane %v345_v41, %v813_v28  ;;  %v387_v16 = vrot.slane %v359_v47, %v813_v28 }
  0x49   :  { %v391_v20 = vrot.slane %v361_v4, %v813_v28  ;;  %v395_v23 = vrot.slane %v363_v8, %v813_v28  ;;  %v831_v8 = vld [vmem:[#allocation7 + $0x10] sm:$0xff] }
  0x4a   :  { %vm257_vm7 = vcmp.gt.f32.partialorder %v831_v8, 0.5 }
  0xb7   :  { %v170_v46 = vpop.permute.xlu0 %169 }
  0xb8   :  { %v172_v51 = vmul.f32 %v170_v46, %v130_v34  ;;  %v173_v52 = vmul.f32 %v170_v46, %v134_v35  ;;  %v174_v53 = vmul.f32 %v170_v46, %v138_v36  ;;  %v175_v54 = vmul.f32 %v170_v46, %v142_v37  ;;  %v312_v35 = vld [vmem:[#allocation5 + $0x30] sm:$0xff] }
  0xb9   :  { %v176_v56 = vmul.f32 %v170_v46, %v146_v38  ;;  %v177_v57 = vmul.f32 %v170_v46, %v150_v39  ;;  %v178_v61 = vmul.f32 %v170_v46, %v154_v40  ;;  %v179_v2 = vmul.f32 %v170_v46, %v158_v45  ;;  %v199_v38 = vpop.permute.xlu1 %198  ;;  %v313_v39 = vld [vmem:[#allocation5 + $0x38] sm:$0xff] }
  0xba   :  { %v180_v62 = vadd.f32 %v172_v51, %v69_v42  ;;  %v181_v63 = vadd.f32 %v173_v52, %v70_v43  ;;  %v182_v0 = vadd.f32 %v174_v53, %v71_v44  ;;  %v183_v3 = vadd.f32 %v175_v54, %v72_v50 }
  0xbb   :  { %v184_v7 = vadd.f32 %v176_v56, %v73_v55  ;;  %v185_v11 = vadd.f32 %v177_v57, %v74_v60  ;;  %v186_v14 = vadd.f32 %v178_v61, %v75_v1  ;;  %v187_v18 = vadd.f32 %v179_v2, %v76_v6 }
  0xbc   :  { %584 = vtanh.f32 %v180_v62  ;;  %v406_v10 = vpop.permute.xlu0 %405 }
  0xbd   :  { %586 = vtanh.f32 %v181_v63  ;;  %v408_v13 = vmul.f32 %v406_v10, %v367_v58  ;;  %v409_v17 = vmul.f32 %v406_v10, %v371_v59  ;;  %v410_v21 = vmul.f32 %v406_v10, %v375_v5 }
  0xbe   :  { %588 = vtanh.f32 %v182_v0  ;;  %v411_v24 = vmul.f32 %v406_v10, %v379_v9  ;;  %v412_v26 = vmul.f32 %v406_v10, %v383_v12  ;;  %v413_v30 = vmul.f32 %v406_v10, %v387_v16 }
  0xbf   :  { %590 = vtanh.f32 %v183_v3  ;;  %v416_v27 = vadd.f32 %v408_v13, %v306_v15  ;;  %v417_v31 = vadd.f32 %v409_v17, %v307_v19  ;;  %v414_v33 = vmul.f32 %v406_v10, %v391_v20 }
  0xc0   :  { %592 = vtanh.f32 %v184_v7  ;;  %v418_v34 = vadd.f32 %v410_v21, %v308_v22  ;;  %v415_v36 = vmul.f32 %v406_v10, %v395_v23  ;;  %v419_v37 = vadd.f32 %v411_v24, %v309_v25 }
  0xc1   :  { %594 = vtanh.f32 %v185_v11  ;;  %v420_v40 = vadd.f32 %v412_v26, %v310_v29  ;;  %v421_v41 = vadd.f32 %v413_v30, %v311_v32  ;;  %v422_v43 = vadd.f32 %v414_v33, %v312_v35  ;;  %v434_v29 = vpop.permute.xlu1 %433 }
  0xc2   :  { %596 = vtanh.f32 %v186_v14  ;;  %v423_v46 = vadd.f32 %v415_v36, %v313_v39 }
  0xc3   :  { %598 = vtanh.f32 %v187_v18 }
  0xc4   :  { %600 = vtanh.f32 %v416_v27 }
  0xc5   :  { %602 = vtanh.f32 %v417_v31 }
  0xc6   :  { %v585_v28 = vpop.eup %584  ;;  %604 = vtanh.f32 %v418_v34 }
  0xc7   :  { %v587_v42 = vpop.eup %586  ;;  %v201_v44 = vmul.f32 %v585_v28, %v199_v38  ;;  %606 = vtanh.f32 %v419_v37 }
  0xc8   :  { %v589_v45 = vpop.eup %588  ;;  %v202_v47 = vmul.f32 %v587_v42, %v199_v38  ;;  %608 = vtanh.f32 %v420_v40 }
  0xc9   :  { %v591_v48 = vpop.eup %590  ;;  %v203_v49 = vmul.f32 %v589_v45, %v199_v38  ;;  %v209_v50 = vrot.slane %v201_v44, 4  ;;  %610 = vtanh.f32 %v421_v41 }
  0xca   :  { %v593_v51 = vpop.eup %592  ;;  %v204_v52 = vmul.f32 %v591_v48, %v199_v38  ;;  %v215_v53 = vrot.slane %v202_v47, 4  ;;  %612 = vtanh.f32 %v422_v43 }
  0xcb   :  { %v595_v54 = vpop.eup %594  ;;  %v205_v55 = vmul.f32 %v593_v51, %v199_v38  ;;  %v210_v56 = vadd.f32 %v209_v50, %v201_v44  ;;  %v221_v57 = vrot.slane %v203_v49, 4  ;;  %614 = vtanh.f32 %v423_v46 }
  0xcc   :  { %v597_v58 = vpop.eup %596  ;;  %v206_v59 = vmul.f32 %v595_v54, %v199_v38  ;;  %v216_v60 = vadd.f32 %v215_v53, %v202_v47  ;;  %v227_v61 = vrot.slane %v204_v52, 4 }
  0xcd   :  { %v599_v62 = vpop.eup %598  ;;  %v207_v63 = vmul.f32 %v597_v58, %v199_v38  ;;  %v211_v0 = vrot.slane %v210_v56, 2  ;;  %v222_v1 = vadd.f32 %v221_v57, %v203_v49  ;;  %v233_v2 = vrot.slane %v205_v55, 4 }
  0xce   :  { %v208_v3 = vmul.f32 %v599_v62, %v199_v38  ;;  %v217_v4 = vrot.slane %v216_v60, 2  ;;  %v228_v5 = vadd.f32 %v227_v61, %v204_v52  ;;  %v239_v6 = vrot.slane %v206_v59, 4  ;;  %v601_v7 = vpop.eup %600 }
  0xcf   :  { %v212_v9 = vadd.f32 %v211_v0, %v210_v56  ;;  %v223_v10 = vrot.slane %v222_v1, 2  ;;  %v234_v11 = vadd.f32 %v233_v2, %v205_v55  ;;  %v245_v12 = vrot.slane %v207_v63, 4  ;;  %v603_v13 = vpop.eup %602 }
  0xd0   :  { %v218_v14 = vadd.f32 %v217_v4, %v216_v60  ;;  %v229_v15 = vrot.slane %v228_v5, 2  ;;  %v240_v16 = vadd.f32 %v239_v6, %v206_v59  ;;  %v251_v17 = vrot.slane %v208_v3, 4  ;;  %v605_v18 = vpop.eup %604 }
  0xd1   :  { %v213_v19 = vrot.slane %v212_v9, 1  ;;  %v224_v20 = vadd.f32 %v223_v10, %v222_v1  ;;  %v235_v21 = vrot.slane %v234_v11, 2  ;;  %v246_v22 = vadd.f32 %v245_v12, %v207_v63  ;;  %v607_v23 = vpop.eup %606 }
  0xd2   :  { %v219_v24 = vrot.slane %v218_v14, 1  ;;  %v230_v25 = vadd.f32 %v229_v15, %v228_v5  ;;  %v241_v26 = vrot.slane %v240_v16, 2  ;;  %v252_v27 = vadd.f32 %v251_v17, %v208_v3  ;;  %v609_v30 = vpop.eup %608 }
  0xd3   :  { %v214_v31 = vadd.f32 %v213_v19, %v212_v9  ;;  %v225_v32 = vrot.slane %v224_v20, 1  ;;  %v236_v33 = vadd.f32 %v235_v21, %v234_v11  ;;  %v247_v34 = vrot.slane %v246_v22, 2  ;;  %v611_v35 = vpop.eup %610 }
  0xd4   :  { %v220_v36 = vadd.f32 %v219_v24, %v218_v14  ;;  %v231_v37 = vrot.slane %v230_v25, 1  ;;  %v242_v38 = vadd.f32 %v241_v26, %v240_v16  ;;  %v253_v39 = vrot.slane %v252_v27, 2  ;;  %v613_v40 = vpop.eup %612 }
  0xd5   :  { %v226_v28 = vadd.f32 %v225_v32, %v224_v20  ;;  %v237_v41 = vrot.slane %v236_v33, 1  ;;  %v248_v42 = vadd.f32 %v247_v34, %v246_v22  ;;  %v436_v43 = vmul.f32 %v601_v7, %v434_v29  ;;  %v615_v44 = vpop.eup %614 }
  0xd6   :  { %v232_v45 = vadd.f32 %v231_v37, %v230_v25  ;;  %v243_v46 = vrot.slane %v242_v38, 1  ;;  %v254_v47 = vadd.f32 %v253_v39, %v252_v27  ;;  %v267_v48 = vsel %vm266_vm0, %v220_v36, %v214_v31 }
  0xd7   :  { %v238_v49 = vadd.f32 %v237_v41, %v236_v33  ;;  %v249_v50 = vrot.slane %v248_v42, 1  ;;  %v269_v51 = vsel %vm268_vm1, %v226_v28, %v267_v48  ;;  %v437_v52 = vmul.f32 %v603_v13, %v434_v29 }
  0xd8   :  { %v244_v53 = vadd.f32 %v243_v46, %v242_v38  ;;  %v255_v54 = vrot.slane %v254_v47, 1  ;;  %v271_v55 = vsel %vm270_vm2, %v232_v45, %v269_v51  ;;  %v438_v56 = vmul.f32 %v605_v18, %v434_v29 }
  0xd9   :  { %v250_v57 = vadd.f32 %v249_v50, %v248_v42  ;;  %v273_v58 = vsel %vm272_vm3, %v238_v49, %v271_v55  ;;  %v439_v59 = vmul.f32 %v607_v23, %v434_v29  ;;  %v440_v60 = vmul.f32 %v609_v30, %v434_v29 }
  0xda   :  { %v256_v61 = vadd.f32 %v255_v54, %v254_v47  ;;  %v275_v62 = vsel %vm274_vm4, %v244_v53, %v273_v58  ;;  %v441_v63 = vmul.f32 %v611_v35, %v434_v29  ;;  %v442_v0 = vmul.f32 %v613_v40, %v434_v29 }
  0xdb   :  { %v277_v1 = vsel %vm276_vm5, %v250_v57, %v275_v62  ;;  %v443_v2 = vmul.f32 %v615_v44, %v434_v29  ;;  %v444_v3 = vrot.slane %v436_v43, 4  ;;  %v450_v4 = vrot.slane %v437_v52, 4 }
  0xdc   :  { %v279_v5 = vsel %vm278_vm6, %v256_v61, %v277_v1  ;;  %v456_v6 = vrot.slane %v438_v56, 4  ;;  %v462_v7 = vrot.slane %v439_v59, 4  ;;  %v468_v9 = vrot.slane %v440_v60, 4 }
  0xdd   :  { %v281_v10 = vsel %vm257_vm7, %v279_v5, -1e+09  ;;  %v445_v11 = vadd.f32 %v444_v3, %v436_v43  ;;  %v451_v12 = vadd.f32 %v450_v4, %v437_v52  ;;  %v474_v13 = vrot.slane %v441_v63, 4 }
  0xde   :  { %v282_v14 = vrot.slane %v281_v10, 4  ;;  %v457_v15 = vadd.f32 %v456_v6, %v438_v56  ;;  %v463_v16 = vadd.f32 %v462_v7, %v439_v59  ;;  %v469_v17 = vadd.f32 %v468_v9, %v440_v60 }
  0xdf   :  { %v446_v18 = vrot.slane %v445_v11, 2  ;;  %v452_v19 = vrot.slane %v451_v12, 2  ;;  %v475_v20 = vadd.f32 %v474_v13, %v441_v63  ;;  %v480_v21 = vrot.slane %v442_v0, 4  ;;  %v67_v63 = vld [vmem:[#allocation7 + $0x28] sm:$0xff] }
  0xe0   :  { %v283_v22 = vmax.f32 %v281_v10, %v282_v14  ;;  %v458_v23 = vrot.slane %v457_v15, 2  ;;  %v464_v24 = vrot.slane %v463_v16, 2  ;;  %v470_v25 = vrot.slane %v469_v17, 2 }
  0xe1   :  { %v447_v26 = vadd.f32 %v446_v18, %v445_v11  ;;  %v453_v27 = vadd.f32 %v452_v19, %v451_v12  ;;  %v476_v29 = vrot.slane %v475_v20, 2  ;;  %v481_v8 = vadd.f32 %v480_v21, %v442_v0 }
  0xe2   :  { %v284_v30 = vrot.slane %v283_v22, 2  ;;  %v459_v31 = vadd.f32 %v458_v23, %v457_v15  ;;  %v465_v32 = vadd.f32 %v464_v24, %v463_v16  ;;  %v471_v33 = vadd.f32 %v470_v25, %v469_v17 }
  0xe3   :  { %v448_v34 = vrot.slane %v447_v26, 1  ;;  %v454_v35 = vrot.slane %v453_v27, 1  ;;  %v477_v36 = vadd.f32 %v476_v29, %v475_v20  ;;  %v482_v37 = vrot.slane %v481_v8, 2  ;;  %v537_v29 = vpop.permute.xlu1 %536 }
  0xe4   :  { %v285_v38 = vmax.f32 %v283_v22, %v284_v30  ;;  %v460_v39 = vrot.slane %v459_v31, 1  ;;  %v466_v40 = vrot.slane %v465_v32, 1  ;;  %v472_v28 = vrot.slane %v471_v33, 1  ;;  %v63_v30 = vld [vmem:[#allocation7 + $0x8] sm:$0xff] }
  0xe5   :  { %v449_v41 = vadd.f32 %v448_v34, %v447_v26  ;;  %v455_v42 = vadd.f32 %v454_v35, %v453_v27  ;;  %v483_v45 = vadd.f32 %v482_v37, %v481_v8  ;;  %v478_v47 = vrot.slane %v477_v36, 1  ;;  %v68_v27 = vld [vmem:[#allocation7 + $0x30] sm:$0x3f] }
  0xe6   :  { %v286_v43 = vrot.slane %v285_v38, 1  ;;  %v461_v44 = vadd.f32 %v460_v39, %v459_v31  ;;  %v467_v46 = vadd.f32 %v466_v40, %v465_v32  ;;  %v486_v48 = vrot.slane %v443_v2, 4 }
  0xe7   :  { %v501_v49 = vsel %vm266_vm0, %v455_v42, %v449_v41  ;;  %v473_v51 = vadd.f32 %v472_v28, %v471_v33  ;;  %v484_v56 = vrot.slane %v483_v45, 1  ;;  %v479_v58 = vadd.f32 %v478_v47, %v477_v36  ;;  %v66_v42 = vld [vmem:[#allocation7 + $0x20] sm:$0xff] }
  0xe8   :  { %v287_v50 = vmax.f32 %v285_v38, %v286_v43  ;;  %v502_v52 = vsel %vm268_vm1, %v461_v44, %v501_v49  ;;  %v487_v53 = vadd.f32 %v486_v48, %v443_v2  ;;  %vm492_vm8 = vcmp.gt.f32.partialorder %v67_v63, 0.5 }
  0xe9   :  { %v503_v54 = vsel %vm270_vm2, %v467_v46, %v502_v52  ;;  %v485_v0 = vadd.f32 %v484_v56, %v483_v45  ;;  %v539_v32 = vmul.f32 %v537_v29, %v68_v27 }
  0xea   :  { %v288_v55 = vsub.f32 %v281_v10, %v287_v50  ;;  %v504_v57 = vsel %vm272_vm3, %v473_v51, %v503_v54  ;;  %v488_v59 = vrot.slane %v487_v53, 2 }
  0xeb   :  { %v505_v62 = vsel %vm274_vm4, %v479_v58, %v504_v57  ;;  %v541_v36 = vsel %vm540_vm9, %v539_v32, 0.0 }
  0xec   :  { %v289_v60 = vmul.f32 1.442695, %v288_v55  ;;  %v489_v61 = vadd.f32 %v488_v59, %v487_v53  ;;  %v506_v3 = vsel %vm276_vm5, %v485_v0, %v505_v62  ;;  %v542_v38 = vrot.slane %v541_v36, 4 }
  0xee   :  { %616 = vpow2.f32 %v289_v60  ;;  %v490_v1 = vrot.slane %v489_v61, 1  ;;  %v543_v40 = vadd.f32 %v542_v38, %v541_v36 }
  0xf0   :  { %v491_v2 = vadd.f32 %v490_v1, %v489_v61  ;;  %v544_v43 = vrot.slane %v543_v40, 2 }
  0xf2   :  { %v507_v4 = vsel %vm278_vm6, %v491_v2, %v506_v3  ;;  %v545_v47 = vadd.f32 %v544_v43, %v543_v40 }
  0xf3   :  { %v509_v5 = vsel %vm492_vm8, %v507_v4, -1e+09 }
  0xf4   :  { %v510_v6 = vrot.slane %v509_v5, 4  ;;  %v546_v51 = vrot.slane %v545_v47, 1 }
  0xf6   :  { %v511_v7 = vmax.f32 %v509_v5, %v510_v6  ;;  %v547_v55 = vadd.f32 %v546_v51, %v545_v47 }
  0xf8   :  { %v617_v9 = vpop.eup %616  ;;  %v512_v10 = vrot.slane %v511_v7, 2 }
  0xf9   :  { %v291_v11 = vrot.slane %v617_v9, 4 }
  0xfa   :  { %v513_v12 = vmax.f32 %v511_v7, %v512_v10 }
  0xfb   :  { %v292_v13 = vadd.f32 %v617_v9, %v291_v11 }
  0xfc   :  { %v514_v14 = vrot.slane %v513_v12, 1 }
  0xfd   :  { %v293_v15 = vrot.slane %v292_v13, 2 }
  0xfe   :  { %v515_v16 = vmax.f32 %v513_v12, %v514_v14 }
  0xff   :  { %v294_v17 = vadd.f32 %v293_v15, %v292_v13 }
 0x100   :  { %v516_v18 = vsub.f32 %v509_v5, %v515_v16 }
 0x101   :  { %v295_v19 = vrot.slane %v294_v17, 1 }
 0x102   :  { %v517_v20 = vmul.f32 1.442695, %v516_v18 }
 0x103   :  { %v296_v21 = vadd.f32 %v295_v19, %v294_v17 }
 0x104   :  { %618 = vpow2.f32 %v517_v20 }
 0x105   :  { %620 = vrcp.f32 %v296_v21 }
 0x10e   :  { %v619_v22 = vpop.eup %618 }
 0x10f   :  { %v519_v23 = vrot.slane %v619_v22, 4  ;;  %v621_v24 = vpop.eup %620 }
 0x110   :  { %v298_v8 = vmul.f32 %v621_v24, %v617_v9 }
 0x111   :  { %v520_v25 = vadd.f32 %v619_v22, %v519_v23 }
 0x112   :  { %v299_v34 = vmul.f32 %v298_v8, %v63_v30 }
 0x113   :  { %v521_v26 = vrot.slane %v520_v25, 2 }
 0x114   :  { %v300_v37 = vrot.slane %v299_v34, 4 }
 0x115   :  { %v522_v31 = vadd.f32 %v521_v26, %v520_v25 }
 0x116   :  { %v301_v39 = vadd.f32 %v300_v37, %v299_v34 }
 0x117   :  { %v523_v33 = vrot.slane %v522_v31, 1 }
 0x118   :  { %v302_v28 = vrot.slane %v301_v39, 2 }
 0x119   :  { %v524_v35 = vadd.f32 %v523_v33, %v522_v31 }
 0x11a   :  { %v303_v45 = vadd.f32 %v302_v28, %v301_v39 }
 0x11b   :  { %622 = vrcp.f32 %v524_v35 }
 0x11c   :  { %v304_v49 = vrot.slane %v303_v45, 1 }
 0x11e   :  { %v305_v53 = vadd.f32 %v304_v49, %v303_v45 }
 0x120   :  { %v548_v58 = vadd.f32 %v547_v55, %v305_v53 }
 0x125   :  { %v623_v41 = vpop.eup %622 }
 0x126   :  { %v526_v44 = vmul.f32 %v623_v41, %v619_v22 }
 0x128   :  { %v527_v46 = vmul.f32 %v526_v44, %v66_v42 }
 0x12a   :  { %v528_v48 = vrot.slane %v527_v46, 4 }
 0x12c   :  { %v529_v50 = vadd.f32 %v528_v48, %v527_v46 }
 0x12e   :  { %v530_v52 = vrot.slane %v529_v50, 2 }
 0x130   :  { %v531_v54 = vadd.f32 %v530_v52, %v529_v50 }
 0x132   :  { %v532_v56 = vrot.slane %v531_v54, 1 }
 0x134   :  { %v533_v57 = vadd.f32 %v532_v56, %v531_v54 }
 0x136   :  { %v549_v59 = vadd.f32 %v548_v58, %v533_v57 }
 0x138   :  { %550 = vst [vmem:[#allocation8] sm:$0x1] %v549_v59 }
 0x139   :  { %701 = shalt.err (!%p698_p0)
}
 0x13a   :  { %s702_s9 = scalar_lea.hbm %s866_s4, 16 }
 0x13b   :  { %p703_p1 = scmp.ne.s32.totalorder %s866_s4, %s702_s9  ;;  %p706_p2 = scmp.lt.u32.totalorder %s702_s9, %s866_s4 }
 0x13d   :  { %p708_p3 = pnand %p706_p2, %p703_p1 }
 0x13f   :  { %711 = shalt.err (!%p708_p3)
}
 0x140   :  { %560 = dma.vmem_to_hbm [thread:$0]  %s558_s28, 16, %s866_s4, [#allocation4]  }
 0x141   :  { %716 = dma.done.wait [#allocation4], 16  }
 0x142   :  { %717 = vsyncadd [#allocation4], 4294967280 }
 0x143   :  { %564 = vsyncpa [#allocation3], 1 }
 0x144   :  { %565 = vsyncpa [#allocation6], 1 }
 0x145   :  { %566 = vsyncpa [#allocation4], 1 }

</bundles_post_ra>
